<compile_context>
chip_gen: v5e
topology: v5e:2x2
jax: 0.10.0
libtpu: 0.0.40
codegen_flags: <defaults>
</compile_context>

<pallas_src>
import functools

import jax
import jax.numpy as jnp
from jax.experimental import pallas as pl
from jax.experimental.pallas import tpu as pltpu

LN_EPS = 1e-5
P = 128  # lane-padded packed-head width (state_dim + act_dim + 1 <= 128)


def _round_up(x, m):
    return (x + m - 1) // m * m


# -----------------------------------------------------------------------------
# Kernel
# -----------------------------------------------------------------------------
def _decision_output_kernel(x_ref, gamma_ref, beta_ref, w_ref, b_ref, out_ref,
                            *, state_dim, act_dim):
    # --- LayerNorm over model_dim (lanes), f32, single-pass variance ---
    x = x_ref[...].astype(jnp.float32)                           # (tm, D)
    mean = jnp.mean(x, axis=-1, keepdims=True)
    var = jnp.mean(x * x, axis=-1, keepdims=True) - mean * mean
    inv = jax.lax.rsqrt(jnp.maximum(var, 0.0) + LN_EPS)          # clamp: cancellation safety
    xn = (x - mean) * inv * gamma_ref[...] + beta_ref[...]       # (tm, D)

    # --- fused three heads: one MXU matmul (f32 accumulate) + f32 bias ---
    y = jnp.dot(xn.astype(w_ref.dtype), w_ref[...],
                preferred_element_type=jnp.float32) + b_ref[...]  # (tm, P)

    # --- tanh only on action columns (static range -> in-kernel iota mask) ---
    col = jax.lax.broadcasted_iota(jnp.int32, y.shape, 1)
    is_act = (col >= state_dim) & (col < state_dim + act_dim)
    y = jnp.where(is_act, jnp.tanh(y), y)

    out_ref[...] = y.astype(out_ref.dtype)


# -----------------------------------------------------------------------------
# One-time parameter packing (hoisted out of the forward path)
# -----------------------------------------------------------------------------
def pack_decision_head_params(params, *, state_dim, act_dim,
                              weight_dtype=jnp.bfloat16):
    """Pack LN + three heads into kernel-ready arrays. Call once at load time.

    weight_dtype=jnp.float32 provides an f32-matmul fallback if the scalar
    return head turns out to be scale-sensitive in the RL pipeline."""
    total = state_dim + act_dim + 1
    assert total <= P, "packed head width exceeds 128 lanes"
    D = params["w_state"].shape[1]

    w = jnp.zeros((D, P), jnp.float32)
    w = w.at[:, 0:state_dim].set(params["w_state"].T)
    w = w.at[:, state_dim:state_dim + act_dim].set(params["w_act"].T)
    w = w.at[:, state_dim + act_dim:total].set(params["w_ret"].T)

    b = jnp.zeros((1, P), jnp.float32)
    b = b.at[:, 0:state_dim].set(params["b_state"][None, :])
    b = b.at[:, state_dim:state_dim + act_dim].set(params["b_act"][None, :])
    b = b.at[:, state_dim + act_dim:total].set(params["b_ret"][None, :])

    return {
        "w_packed": w.astype(weight_dtype),   # bf16 default: native MXU, half the weight DMA
        "b_packed": b,
        "ln_gamma": params["ln_gamma"][None, :].astype(jnp.float32),
        "ln_beta": params["ln_beta"][None, :].astype(jnp.float32),
    }


# -----------------------------------------------------------------------------
# Tile / VMEM sizing
# -----------------------------------------------------------------------------
def _vmem_budget_bytes():
    # ~1/3 of physical VMEM (leaves headroom for compiler scratch and for the
    # second TensorCore's work on megacore parts), capped. Falls back to a
    # conservative value that fits v5e / v6e / v7x if the query is unavailable.
    try:
        info_fn = getattr(pltpu, "get_tpu_info", None)
        if info_fn is not None:
            cap = getattr(info_fn(), "vmem_capacity_bytes", None)
            if cap:
                return int(min(cap // 3, 48 << 20))
    except Exception:
        pass
    return 24 << 20


def _vmem_bytes(tm, D, in_itemsize, out_itemsize):
    # Honest footprint: double-buffered pipelined blocks PLUS compiler scratch
    # for the LN chain (f32 copy of x, live xn, bf16 matmul operand).
    x_blocks = 2 * tm * D * in_itemsize
    out_blocks = 2 * tm * P * out_itemsize
    consts = D * P * 4 + 2 * D * 4 + P * 4
    ln_scratch = 3 * tm * D * 4
    return x_blocks + out_blocks + consts + ln_scratch


def _choose_row_tile(N, D, in_itemsize, out_itemsize, row_multiple, budget):
    tm = row_multiple
    for cand in (1024, 512, 256, 128, 64, 32, 16, 8):
        if cand % row_multiple:
            continue
        if _vmem_bytes(cand, D, in_itemsize, out_itemsize) <= budget:
            tm = cand
            break
    # Clamp to the (sublane-rounded) problem size -- boundary block is masked.
    tm = min(tm, _round_up(N, row_multiple))
    tm = max(tm, row_multiple)
    # v7x megacore: ensure >= 2 grid steps so the "parallel" axis shards across
    # both TensorCores; costs one extra tiny step on single-TC chips.
    if pl.cdiv(N, tm) < 2 and N > row_multiple:
        tm = max(row_multiple, _round_up(pl.cdiv(N, 2), row_multiple))
    return tm


# -----------------------------------------------------------------------------
# Forward wrapper
# -----------------------------------------------------------------------------
def decision_output(hidden_states, packed, *, state_dim, act_dim, tm=None):
    """hidden_states: (B, T, D). Returns (state_preds, action_preds, return_preds).

    Prefer feeding bf16 hidden_states when the upstream transformer already
    runs in bf16: the kernel is HBM-read-bound on this (N, D) stream and LN
    math stays f32 inside the kernel regardless of input dtype."""
    B, T, D = hidden_states.shape
    N = B * T
    x2d = hidden_states.reshape(N, D)

    out_dtype = hidden_states.dtype
    in_itemsize = jnp.dtype(hidden_states.dtype).itemsize
    out_itemsize = jnp.dtype(out_dtype).itemsize
    # Min sublane tile: 8 rows for 32-bit, 16 rows for 16-bit blocks.
    row_multiple = 16 if min(in_itemsize, out_itemsize) < 4 else 8

    budget = _vmem_budget_bytes()
    if tm is None:
        tm = _choose_row_tile(N, D, in_itemsize, out_itemsize, row_multiple, budget)
    grid = (pl.cdiv(N, tm),)   # no wrapper-side padding; boundary block is masked

    kernel = functools.partial(_decision_output_kernel,
                               state_dim=state_dim, act_dim=act_dim)

    cost = pl.CostEstimate(
        flops=2 * N * D * P + 8 * N * D,
        transcendentals=N * (act_dim + 1),
        bytes_accessed=N * D * in_itemsize + N * P * out_itemsize + D * P * 4,
    )

    out = pl.pallas_call(
        kernel,
        out_shape=jax.ShapeDtypeStruct((N, P), out_dtype),
        grid_spec=pltpu.PrefetchScalarGridSpec(
            num_scalar_prefetch=0,
            grid=grid,
            in_specs=[
                pl.BlockSpec((tm, D), lambda i: (i, 0)),   # x row tile
                pl.BlockSpec((1, D), lambda i: (0, 0)),    # LN gamma (resident)
                pl.BlockSpec((1, D), lambda i: (0, 0)),    # LN beta  (resident)
                pl.BlockSpec((D, P), lambda i: (0, 0)),    # packed head weights
                pl.BlockSpec((1, P), lambda i: (0, 0)),    # packed head biases
            ],
            out_specs=pl.BlockSpec((tm, P), lambda i: (i, 0)),
        ),
        compiler_params=pltpu.CompilerParams(
            dimension_semantics=("parallel",),
            vmem_limit_bytes=int(min(max(budget * 3 // 2, 32 << 20), 96 << 20)),
        ),
        cost_estimate=cost,
    )(x2d, packed["ln_gamma"], packed["ln_beta"],
      packed["w_packed"], packed["b_packed"])

    total = state_dim + act_dim + 1
    state_preds = out[:, 0:state_dim].reshape(B, T, state_dim)
    action_preds = out[:, state_dim:state_dim + act_dim].reshape(B, T, act_dim)
    return_preds = out[:, state_dim + act_dim:total].reshape(B, T, 1)
    return state_preds, action_preds, return_preds


# -----------------------------------------------------------------------------
# Pure-JAX reference
# -----------------------------------------------------------------------------
def _reference(hidden_states, params):
    x = hidden_states.astype(jnp.float32)
    mean = jnp.mean(x, axis=-1, keepdims=True)
    var = jnp.mean((x - mean) ** 2, axis=-1, keepdims=True)
    xn = (x - mean) / jnp.sqrt(var + LN_EPS) * params["ln_gamma"] + params["ln_beta"]
    s = xn @ params["w_state"].T + params["b_state"]
    a = jnp.tanh(xn @ params["w_act"].T + params["b_act"])
    r = xn @ params["w_ret"].T + params["b_ret"]
    return s, a, r


if __name__ == "__main__":
    D = 32                       # model_dim
    STATE_DIM, ACT_DIM = 17, 6   # self.state_dim / self.act_dim (set outside __init__)

    key = jax.random.PRNGKey(0)
    ks = jax.random.split(key, 8)

    params = {
        "ln_gamma": jnp.ones((D,), jnp.float32),
        "ln_beta": jnp.zeros((D,), jnp.float32),
        "w_state": jax.random.normal(ks[1], (STATE_DIM, D), jnp.float32) * 0.05,
        "b_state": jax.random.normal(ks[2], (STATE_DIM,), jnp.float32) * 0.05,
        "w_act":   jax.random.normal(ks[3], (ACT_DIM, D), jnp.float32) * 0.05,
        "b_act":   jax.random.normal(ks[4], (ACT_DIM,), jnp.float32) * 0.05,
        "w_ret":   jax.random.normal(ks[5], (1, D), jnp.float32) * 0.05,
        "b_ret":   jax.random.normal(ks[6], (1,), jnp.float32) * 0.05,
    }
    packed = pack_decision_head_params(params, state_dim=STATE_DIM, act_dim=ACT_DIM)

    # Case 1: f32 activations, N a multiple of the row tile.
    B, T = 2, 8
    h32 = jax.random.normal(ks[0], (B, T, D), jnp.float32)
    s, a, r = decision_output(h32, packed, state_dim=STATE_DIM, act_dim=ACT_DIM)
    jax.block_until_ready((s, a, r))
    s_ref, a_ref, r_ref = _reference(h32, params)
    assert s.shape == (B, T, STATE_DIM) and a.shape == (B, T, ACT_DIM) and r.shape == (B, T, 1)
    assert jnp.allclose(s, s_ref, atol=2e-2, rtol=2e-2)
    assert jnp.allclose(a, a_ref, atol=2e-2, rtol=2e-2)
    assert jnp.allclose(r, r_ref, atol=2e-2, rtol=2e-2)

    # Case 2: bf16 activations, ragged N (exercises the masked boundary block,
    # no wrapper-side padding / slicing copies).
    B2, T2 = 3, 7
    h16 = jax.random.normal(ks[7], (B2, T2, D), jnp.float32).astype(jnp.bfloat16)
    s2, a2, r2 = decision_output(h16, packed, state_dim=STATE_DIM, act_dim=ACT_DIM)
    jax.block_until_ready((s2, a2, r2))
    s2_ref, a2_ref, r2_ref = _reference(h16, params)
    assert s2.shape == (B2, T2, STATE_DIM) and a2.shape == (B2, T2, ACT_DIM) and r2.shape == (B2, T2, 1)
    assert jnp.allclose(s2.astype(jnp.float32), s2_ref, atol=4e-2, rtol=4e-2)
    assert jnp.allclose(a2.astype(jnp.float32), a2_ref, atol=4e-2, rtol=4e-2)
    assert jnp.allclose(r2.astype(jnp.float32), r2_ref, atol=4e-2, rtol=4e-2)

    print("KERNEL_OK")
</pallas_src>

<mosaic_0001>
module attributes {stable_mosaic.version = 11 : i64} {
  func.func @_decision_output_kernel(%arg0: i32, %arg1: memref<8x32xf32, #tpu.memory_space<vmem>>, %arg2: memref<1x32xf32, #tpu.memory_space<vmem>>, %arg3: memref<1x32xf32, #tpu.memory_space<vmem>>, %arg4: memref<32x128xbf16, #tpu.memory_space<vmem>>, %arg5: memref<1x128xf32, #tpu.memory_space<vmem>>, %arg6: memref<8x128xf32, #tpu.memory_space<vmem>>) attributes {dimension_semantics = [#tpu.dimension_semantics<parallel>], iteration_bounds = array<i64: 2>, scalar_prefetch = 0 : i64, scratch_operands = 0 : i64, tpu.core_type = #tpu.core_type<tc>, window_params = [{transform_indices = @transform_0, window_bounds = array<i64: 8, 32>}, {pipeline_mode = #tpu.pipeline_mode<synchronous>, transform_indices = @transform_1, window_bounds = array<i64: 1, 32>}, {pipeline_mode = #tpu.pipeline_mode<synchronous>, transform_indices = @transform_2, window_bounds = array<i64: 1, 32>}, {pipeline_mode = #tpu.pipeline_mode<synchronous>, transform_indices = @transform_3, window_bounds = array<i64: 32, 128>}, {pipeline_mode = #tpu.pipeline_mode<synchronous>, transform_indices = @transform_4, window_bounds = array<i64: 1, 128>}, {transform_indices = @transform_5, window_bounds = array<i64: 8, 128>}]} {
    %c0 = arith.constant 0 : index
    %c0_0 = arith.constant 0 : index
    %0 = vector.load %arg1[%c0, %c0_0] : memref<8x32xf32, #tpu.memory_space<vmem>>, vector<8x32xf32>
    %cst = arith.constant dense<0.000000e+00> : vector<8xf32>
    %1 = vector.multi_reduction <add>, %0, %cst [1] : vector<8x32xf32> to vector<8xf32>
    %2 = vector.shape_cast %1 : vector<8xf32> to vector<8x1xf32>
    %cst_1 = arith.constant 3.200000e+01 : f32
    %3 = vector.broadcast %cst_1 : f32 to vector<8x1xf32>
    %4 = arith.divf %2, %3 : vector<8x1xf32>
    %5 = arith.mulf %0, %0 : vector<8x32xf32>
    %cst_2 = arith.constant dense<0.000000e+00> : vector<8xf32>
    %6 = vector.multi_reduction <add>, %5, %cst_2 [1] : vector<8x32xf32> to vector<8xf32>
    %7 = vector.shape_cast %6 : vector<8xf32> to vector<8x1xf32>
    %cst_3 = arith.constant 3.200000e+01 : f32
    %8 = vector.broadcast %cst_3 : f32 to vector<8x1xf32>
    %9 = arith.divf %7, %8 : vector<8x1xf32>
    %10 = arith.mulf %4, %4 : vector<8x1xf32>
    %11 = arith.subf %9, %10 : vector<8x1xf32>
    %cst_4 = arith.constant 0.000000e+00 : f32
    %12 = vector.broadcast %cst_4 : f32 to vector<8x1xf32>
    %13 = arith.maximumf %11, %12 : vector<8x1xf32>
    %cst_5 = arith.constant 9.99999974E-6 : f32
    %14 = vector.broadcast %cst_5 : f32 to vector<8x1xf32>
    %15 = arith.addf %13, %14 : vector<8x1xf32>
    %16 = math.rsqrt %15 : vector<8x1xf32>
    %17 = vector.broadcast %4 : vector<8x1xf32> to vector<8x32xf32>
    %18 = arith.subf %0, %17 : vector<8x32xf32>
    %19 = vector.broadcast %16 : vector<8x1xf32> to vector<8x32xf32>
    %20 = arith.mulf %18, %19 : vector<8x32xf32>
    %c0_6 = arith.constant 0 : index
    %c0_7 = arith.constant 0 : index
    %21 = vector.load %arg2[%c0_6, %c0_7] : memref<1x32xf32, #tpu.memory_space<vmem>>, vector<1x32xf32>
    %22 = vector.broadcast %21 : vector<1x32xf32> to vector<8x32xf32>
    %23 = arith.mulf %20, %22 : vector<8x32xf32>
    %c0_8 = arith.constant 0 : index
    %c0_9 = arith.constant 0 : index
    %24 = vector.load %arg3[%c0_8, %c0_9] : memref<1x32xf32, #tpu.memory_space<vmem>>, vector<1x32xf32>
    %25 = vector.broadcast %24 : vector<1x32xf32> to vector<8x32xf32>
    %26 = arith.addf %23, %25 : vector<8x32xf32>
    %27 = arith.truncf %26 : vector<8x32xf32> to vector<8x32xbf16>
    %c0_10 = arith.constant 0 : index
    %c0_11 = arith.constant 0 : index
    %28 = vector.load %arg4[%c0_10, %c0_11] : memref<32x128xbf16, #tpu.memory_space<vmem>>, vector<32x128xbf16>
    %cst_12 = arith.constant dense<0.000000e+00> : vector<8x128xf32>
    %29 = tpu.matmul %27, %28, %cst_12 {dimension_numbers = #tpu.dot_dimension_numbers<[1], [0], [0], [1], [0, 0, 1, 1], [], []>} : vector<8x32xbf16>, vector<32x128xbf16>, vector<8x128xf32> -> vector<8x128xf32>
    %c0_13 = arith.constant 0 : index
    %c0_14 = arith.constant 0 : index
    %30 = vector.load %arg5[%c0_13, %c0_14] : memref<1x128xf32, #tpu.memory_space<vmem>>, vector<1x128xf32>
    %31 = vector.broadcast %30 : vector<1x128xf32> to vector<8x128xf32>
    %32 = arith.addf %29, %31 : vector<8x128xf32>
    %33 = tpu.iota {dimensions = array<i32: 1>} : vector<8x128xi32>
    %c17_i32 = arith.constant 17 : i32
    %34 = vector.broadcast %c17_i32 : i32 to vector<8x128xi32>
    %35 = arith.cmpi sge, %33, %34 : vector<8x128xi32>
    %c23_i32 = arith.constant 23 : i32
    %36 = vector.broadcast %c23_i32 : i32 to vector<8x128xi32>
    %37 = arith.cmpi slt, %33, %36 : vector<8x128xi32>
    %38 = arith.andi %35, %37 : vector<8x128xi1>
    %39 = math.tanh %32 : vector<8x128xf32>
    %40 = arith.select %38, %39, %32 : vector<8x128xi1>, vector<8x128xf32>
    %c0_15 = arith.constant 0 : index
    %c0_16 = arith.constant 0 : index
    %41 = vector.load %arg6[%c0_15, %c0_16] : memref<8x128xf32, #tpu.memory_space<vmem>>, vector<8x128xf32>
    tpu.vector_store %arg6[%c0_15, %c0_16], %40 {strides = array<i32>} : memref<8x128xf32, #tpu.memory_space<vmem>>, vector<8x128xf32>,
    return
  }
  func.func @transform_0(%arg0: i32) -> (i32, i32) {
    %c0_i32 = arith.constant 0 : i32
    %c0_i32_0 = arith.constant 0 : i32
    return %arg0, %c0_i32 : i32, i32
  }
  func.func @transform_1(%arg0: i32) -> (i32, i32) {
    %c0_i32 = arith.constant 0 : i32
    %c0_i32_0 = arith.constant 0 : i32
    %c0_i32_1 = arith.constant 0 : i32
    return %c0_i32, %c0_i32_0 : i32, i32
  }
  func.func @transform_2(%arg0: i32) -> (i32, i32) {
    %c0_i32 = arith.constant 0 : i32
    %c0_i32_0 = arith.constant 0 : i32
    %c0_i32_1 = arith.constant 0 : i32
    return %c0_i32, %c0_i32_0 : i32, i32
  }
  func.func @transform_3(%arg0: i32) -> (i32, i32) {
    %c0_i32 = arith.constant 0 : i32
    %c0_i32_0 = arith.constant 0 : i32
    %c0_i32_1 = arith.constant 0 : i32
    return %c0_i32, %c0_i32_0 : i32, i32
  }
  func.func @transform_4(%arg0: i32) -> (i32, i32) {
    %c0_i32 = arith.constant 0 : i32
    %c0_i32_0 = arith.constant 0 : i32
    %c0_i32_1 = arith.constant 0 : i32
    return %c0_i32, %c0_i32_0 : i32, i32
  }
  func.func @transform_5(%arg0: i32) -> (i32, i32) {
    %c0_i32 = arith.constant 0 : i32
    %c0_i32_0 = arith.constant 0 : i32
    return %arg0, %c0_i32 : i32, i32
  }
}

</mosaic_0001>

<bundles_post_ra>
// kernel: tpu_custom_call.1
= control target key start
LH: loop header
LB: loop body
LE: loop exit
PB: predicated region body
PF: predicated region fallthrough
CT: control target
= control target key end

     0   :  { %10 = vsyncpa [#allocation3], 0  ;;  %s925_s0 = inlined_call_operand.hbm [shape: f32[16,32], index: 0, kind: input, shape index: {}]   ;;  %s926_s1 = inlined_call_operand.hbm [shape: f32[1,32], index: 1, kind: input, shape index: {}]   ;;  %s927_s2 = inlined_call_operand.vmem [shape: f32[1,32], index: 2, kind: input, shape index: {}]   ;;  %s928_s3 = inlined_call_operand.hbm [shape: bf16[32,128], index: 3, kind: input, shape index: {}]   ;;  %s929_s4 = inlined_call_operand.vmem [shape: f32[1,128], index: 4, kind: input, shape index: {}]   ;;  %s930_s5 = inlined_call_operand.hbm [shape: f32[16,128], index: 5, kind: output, shape index: {}]  }
   0x1   :  { %12 = vsyncpa [#allocation3 + $0x1], 0 }
   0x2   :  { %13 = vsyncpa [#allocation6], 0 }
   0x3   :  { %14 = vsyncpa [#allocation4], 0 }
   0x4   :  { %16 = vsyncpa [#allocation4 + $0x1], 0  ;;  %s771_s18 = smov 0   ;;  %s773_s19 = smov 0  }
   0x5   :  { %s775_s20 = smov 0   ;;  %s777_s21 = smov 0  }
   0x6 LB: > { %s792_s22 = sadd.s32 4294967295, %s734_s21   ;;  %s468_s23 = sadd.s32 4294967294, %s734_s21   ;;  %s734_s21 = sphi %s777_s21, %s940_s21   ;;  %s730_s20 = sphi %s775_s20, %s939_s20   ;;  %s726_s19 = sphi %s773_s19, %s938_s19   ;;  %s722_s18 = sphi %s771_s18, %s937_s18  }
   0x7   : > { %p42_p0 = scmp.ne.s32.totalorder %s726_s19, %s722_s18  ;;  %p43_p1 = scmp.eq.s32.totalorder %s792_s22, 0 }
   0x8   : > { %p150_p2 = scmp.eq.s32.totalorder %s792_s22, 1  ;;  %p156_p3 = scmp.eq.s32.totalorder %s468_s23, 1 }
   0x9   : > { %p801_p4 = por %p43_p1, %p42_p0  ;;  %p469_p5 = scmp.ge.s32.totalorder %s734_s21, 1 }
   0xa   : > { %p806_p6 = por %p156_p3, %p42_p0  ;;  %p163_p7 = scmp.lt.s32.totalorder %s734_s21, 3 }
   0xb   : > { %s175_s28 = sshll.u32 %s926_s1, 4  ;;  %s736_s30 = smov [#allocation5]   ;;  %s176_s28 = int_to_ptr.hbm [resolvable:$true] %s175_s28 }
   0xc   : > { %p814_p8 = pnand %p469_p5, %p163_p7  ;;  %s177_s6 = sshll.u32 %s736_s30, 4  ;;  %s178_s6 = int_to_ptr.vmem [resolvable:$true] %s177_s6 }
   0xd   : > { %s189_s9 = sshll.u32 %s928_s3, 4  ;;  %s737_s10 = smov [#allocation7]   ;;  %s190_s9 = int_to_ptr.hbm [resolvable:$true] %s189_s9 }
   0xe   : > { %p507_p10 = pneg %p814_p8  ;;  %s191_s11 = sshll.u32 %s737_s10, 4  ;;  %s192_s11 = int_to_ptr.vmem [resolvable:$true] %s191_s11 }
   0xf   : > { %s738_s12 = smov 64   ;;  %s739_s13 = smov 4  }
  0x10   : > { %p508_p11 = pnand %p507_p10, %p43_p1  ;;  %s827_s14 = sadd.s32 1, %s734_s21  }
  0x11   : > { %s26_s15 = ssub.s32 %s734_s21, %s827_s14  ;;  %s29_s16 = sadd.s32 1, %s730_s20 }
  0x12   : > { %510 = dma.hbm_to_vmem [thread:$0]  (!%p508_p11), %s176_s28, 16, %s178_s6, [#allocation6]  }
  0x13   : > { %513 = dma.hbm_to_vmem [thread:$0]  (!%p508_p11), %s190_s9, 256, %s192_s11, [#allocation6], %s738_s12, %s738_s12, %s739_s13  }
  0x14   : > { %p27_p12 = scmp.eq.s32.totalorder %s26_s15, 0  ;;  %p36_p13 = scmp.ne.s32.totalorder %s730_s20, %s726_s19 }
  0x15   : > { %p37_p0 = scmp.eq.s32.totalorder %s734_s21, 0  ;;  %p524_p7 = scmp.lt.s32.totalorder %s734_s21, 2 }
  0x16   : > { %s836_s17 = scalar_select %p27_p12, %s730_s20, %s29_s16  }
  0x17   : > { %p38_p3 = por %p37_p0, %p36_p13  ;;  %p840_p5 = por %p150_p2, %p36_p13 }
  0x18   : > { %s208_s26 = sand.u32 1, %s730_s20   ;;  %s474_s28 = sshll.u32 %s734_s21, 3 }
  0x19   : > { %s473_s27 = sshll.u32 %s208_s26, 3  ;;  %s216_s7 = scalar_lea.hbm %s925_s0, %s474_s28 }
  0x1a   : > { %s212_s8 = scalar_lea.vmem [#allocation2], %s473_s27  ;;  %s218_s10 = sshll.u32 %s216_s7, 4  ;;  %s219_s10 = int_to_ptr.hbm [resolvable:$true] %s218_s10 }
  0x1b   : > { %s220_s9 = sshll.u32 %s212_s8, 4  ;;  %p850_p10 = pnand %p524_p7, %p38_p3  ;;  %s221_s9 = int_to_ptr.vmem [resolvable:$true] %s220_s9 }
  0x1c   : > { %s209_s12 = scalar_lea.sflag [#allocation3], %s208_s26  ;;  %s634_s13 = sshra.s32 %s219_s10, 4  ;;  %s635_s13 = int_to_ptr.hbm [resolvable:$true] %s634_s13 }
  0x1d   : > { %s636_s15 = scalar_lea.hbm %s635_s13, 8  ;;  %p638_p11 = pneg %p850_p10 }
  0x1e   : > { %p637_p2 = scmp.ne.s32.totalorder %s635_s13, %s636_s15  ;;  %s641_s28 = scalar_lea.hbm %s925_s0, 16 }
  0x1f   : > { %p642_p0 = scmp.lt.s32.totalorder %s635_s13, %s925_s0  ;;  %p643_p3 = scmp.lt.s32.totalorder %s641_s28, %s636_s15 }
  0x20   : > { %p639_p12 = pnand %p638_p11, %p637_p2 }
  0x21   : > { %p644_p7 = por %p643_p3, %p642_p0 }
  0x22   : > { %p640_p13 = pneg %p639_p12 }
  0x24   : > { %p645_p9 = pnand %p644_p7, %p640_p13 }
  0x26   : > { %648 = shalt.err (!%p645_p9)
}
  0x27   : > { %517 = dma.hbm_to_vmem [thread:$0]  (!%p850_p10), %s219_s10, 128, %s221_s9, %s209_s12  }
  0x28   : > { %229 = sbr.rel (%p814_p8) target bundleno = 347 (0x15b), region = 40  ;;  %s867_s26 = sand.u32 (!%p814_p8), 1, %s726_s19  }
  0x29   : > { %s476_s7 = sshll.u32 (!%p814_p8), %s867_s26, 3  ;;  %s232_s8 = scalar_lea.sflag (!%p814_p8), [#allocation3], %s867_s26 }
  0x2a   : > { %s235_s13 = scalar_lea.vmem (!%p814_p8), [#allocation2], %s476_s7 }
  0x2d   : > { %709 = dma.done.wait (%p801_p4), %s232_s8, 128  }
  0x2e   : > { %711 = vsyncadd (%p801_p4), %s232_s8, 4294967168 }
  0x2f   : > { %713 = dma.done.wait (%p43_p1), [#allocation6], 272  }
  0x30   : > { %715 = vsyncadd (%p43_p1), [#allocation6], 4294967024  ;;  %vm275_vm0 = vcmask 261120   ;;  %v274_v0 = vld [vmem:[%s235_s13] sm:$0xff]  ;;  %v740_v4 = vmov 32.0   ;;  %v493_v13 = vld [vmem:[#allocation7] sm:$0xff]  ;;  %v355_v35 = vlaneseq }
  0x31   : > { %v276_v1 = vsel %vm275_vm0, %v274_v0, 0.0  ;;  %v287_v2 = vmul.f32 %v274_v0, %v274_v0  ;;  %568 = vrcp.f32 %v740_v4  ;;  %v494_v11 = vld [vmem:[#allocation7 + $0x8] sm:$0xff]  ;;  %v565_v28 = vld [vmem:[#allocation5] ss:$0 sm:$0xff]  ;;  %s490_s11 = sshll.u32 %s792_s22, 3  ;;  %s272_s27 = scalar_lea.vmem [#allocation8], %s476_s7 }
  0x32   : > { %277 = vadd.xlane.f32.xlu0 %v276_v1  ;;  %348 = vmatpush.bf16.msra.mxu0 %v494_v11  ;;  %v566_v31 = vld [vmem:[%s927_s2] ss:$0 sm:$0xff]  ;;  %v356_v38 = vand.u32 127, %v355_v35  ;;  %s374_s16 = scalar_lea.hbm %s930_s5, %s490_s11  ;;  %s376_s28 = sshll.u32 %s272_s27, 4  ;;  %s377_s28 = int_to_ptr.vmem [resolvable:$true] %s376_s28 }
  0x33   : > { %v288_v3 = vsel %vm275_vm0, %v287_v2, 0.0  ;;  %v567_v36 = vld [vmem:[%s929_s4] ss:$0 sm:$0xff]  ;;  %s378_s30 = sshll.u32 %s374_s16, 4  ;;  %s364_s22 = scalar_lea.sflag [#allocation4], %s867_s26  ;;  %s379_s30 = int_to_ptr.hbm [resolvable:$true] %s378_s30 }
  0x34   : > { %vm357_vm5 = vcmp.ge.s32.totalorder %v356_v38, 17  ;;  %vm358_vm6 = vcmp.lt.s32.totalorder %v356_v38, 23  ;;  %s678_s6 = sshra.s32 %s379_s30, 4  ;;  %s684_s7 = scalar_lea.hbm %s930_s5, 16  ;;  %s679_s6 = int_to_ptr.hbm [resolvable:$true] %s678_s6 }
  0x35   : > { %vm359_vm7 = vmand %vm357_vm5, %vm358_vm6  ;;  %s680_s8 = scalar_lea.hbm %s679_s6, 8  ;;  %p685_p9 = scmp.lt.s32.totalorder %s679_s6, %s930_s5 }
  0x36   : > { %349 = vmatpush.bf16.msra.mxu0 %v493_v13  ;;  %p681_p1 = scmp.ne.s32.totalorder %s679_s6, %s680_s8  ;;  %p686_p10 = scmp.lt.s32.totalorder %s684_s7, %s680_s8 }
  0x37   : > { %v569_v5 = vpop.eup %568 }
  0x38   : > { %v280_v6 = vmul.f32 32.0, %v569_v5  ;;  %vm284_vm1 = vweird.f32 %v569_v5  ;;  %p682_p4 = pnand %p681_p1, %p840_p5  ;;  %p687_p2 = por %p686_p10, %p685_p9 }
  0x3a   : > { %289 = vadd.xlane.f32.xlu0 %v288_v3  ;;  %v281_v7 = vsub.f32 1.0, %v280_v6  ;;  %p683_p8 = pneg %p682_p4 }
  0x3c   : > { %v282_v8 = vmul.f32 %v569_v5, %v281_v7  ;;  %p688_p11 = pnand %p687_p2, %p683_p8 }
  0x3e   : > { %v283_v9 = vadd.f32 %v569_v5, %v282_v8 }
  0x40   : > { %v285_v12 = vsel %vm284_vm1, %v569_v5, %v283_v9 }
  0xa5   : > { %v278_v10 = vpop.xlane.xlu0 %277 }
  0xa6   : > { %v286_v14 = vmul.f32 %v285_v12, %v278_v10 }
  0xa8   : > { %v292_v16 = vmul.f32 %v286_v14, %v286_v14  ;;  %v306_v27 = vsub.f32 %v274_v0, %v286_v14 }
  0xad   : > { %v290_v15 = vpop.xlane.xlu0 %289 }
  0xae   : > { %v291_v17 = vmul.f32 %v290_v15, %v285_v12 }
  0xb0   : > { %v293_v18 = vsub.f32 %v291_v17, %v292_v16 }
  0xb2   : > { %v294_v19 = vmax.f32 %v293_v18, 0.0 }
  0xb4   : > { %v295_v20 = vadd.f32 1e-05, %v294_v19 }
  0xb6   : > { %570 = vrsqrt.f32 %v295_v20  ;;  %vm302_vm3 = vweird.f32 %v295_v20 }
  0xbc   : > { %v571_v21 = vpop.eup %570 }
  0xbd   : > { %v297_v22 = vmul.f32 %v571_v21, %v295_v20  ;;  %vm303_vm2 = vweird.f32 %v571_v21 }
  0xbe   : > { %vm304_vm4 = vmor %vm302_vm3, %vm303_vm2 }
  0xbf   : > { %v298_v23 = vmul.f32 %v571_v21, %v297_v22 }
  0xc1   : > { %v299_v24 = vmul.f32 0.5, %v298_v23 }
  0xc3   : > { %v300_v25 = vsub.f32 1.5, %v299_v24 }
  0xc5   : > { %v301_v26 = vmul.f32 %v571_v21, %v300_v25 }
  0xc7   : > { %v305_v29 = vsel %vm304_vm4, %v571_v21, %v301_v26 }
  0xc8   : > { %v307_v30 = vmul.f32 %v306_v27, %v305_v29 }
  0xca   : > { %v312_v32 = vmul.f32 %v565_v28, %v307_v30 }
  0xcc   : > { %v317_v33 = vadd.f32 %v566_v31, %v312_v32 }
  0xce   : > { %v318_v34 = vpack.c.bf16 %v317_v33, %v317_v33 }
  0xd0   : > { %488 = vmatmul.msk.bf16.vlgmr.msra.gmra.mxu0 %vm275_vm0, %v318_v34 }
 0x14d   : > { %v351_v37 = vpop.f32.mrf.mxu0 }
 0x14e   : > { %v352_v39 = vadd.f32 %v567_v36, %v351_v37 }
 0x150   : > { %572 = vtanh.f32 %v352_v39 }
 0x155   : > { %v353_v40 = vpop.f32.mrf.mxu0 }
 0x156   : > { %v573_v41 = vpop.eup %572 }
 0x157   : > { %v361_v42 = vsel %vm359_vm7, %v573_v41, %v352_v39 }
 0x158   : > { %362 = vst [vmem:[%s272_s27] sm:$0xff] %v361_v42 }
 0x159   : > { %691 = shalt.err (!%p688_p11)
}
 0x15a   : > { %505 = dma.vmem_to_hbm [thread:$0]  (%p840_p5), %s377_s28, 128, %s379_s30, %s364_s22  }
 0x15b PF: > { %s390_s26 = sand.u32 1, %s722_s18   ;;  %p936_p12 = scmp.ge.s32.totalorder %s734_s21, 2 }
 0x15c   : > { %s391_s10 = scalar_lea.sflag [#allocation4], %s390_s26 }
 0x15d   : > { %p519_p13 = pnand %p936_p12, %p806_p6 }
 0x15f   : > { %p520_p0 = pneg %p519_p13 }
 0x161   : > { %717 = dma.done.wait (%p520_p0), %s391_s10, 128  }
 0x162   : > { %719 = vsyncadd (%p520_p0), %s391_s10, 4294967168  ;;  %p19_p3 = scmp.ge.s32.totalorder %s827_s14, 4   ;;  %s937_s18 = smov %s726_s19 }
 0x163   : > { %s938_s19 = smov %s730_s20  ;;  %s939_s20 = smov %s836_s17 }
 0x164   : > { %s940_s21 = smov %s827_s14  ;;  %21 = sbr.rel (!%p19_p3) target bundleno = 6 (0x6), region = 93 }
 0x169   :  { %397 = vsyncpa [#allocation3], 1 }
 0x16a   :  { %399 = vsyncpa [#allocation3 + $0x1], 1 }
 0x16b   :  { %400 = vsyncpa [#allocation6], 1 }
 0x16c   :  { %401 = vsyncpa [#allocation4], 1 }
 0x16d   :  { %403 = vsyncpa [#allocation4 + $0x1], 1 }

</bundles_post_ra>
